<compile_context>
chip_gen: v7x
topology: tpu7x:2x2x1
jax: 0.10.0
libtpu: 0.0.40
codegen_flags: <defaults>
</compile_context>

<pallas_src>
import functools

import jax
import jax.numpy as jnp
from jax.experimental import pallas as pl
from jax.experimental.pallas import tpu as pltpu

NUM_CLASSES = 7
_LANE = 128
_SUBLANE = 8
# Keep folded weights VMEM-resident only while their lane-padded footprint
# (2 weights * Dp rows * 128 lanes * 2 B) stays small.
_RESIDENT_WEIGHT_VMEM_BUDGET = 8 * 1024 * 1024


def _cdiv(a, b):
    return -(-a // b)


def _round_up(x, m):
    return _cdiv(x, m) * m


def _pick_k_tile(D, tk_max):
    """K tile: full extent if it fits, else a multiple of 128 (exact divisor
    of D when possible so no padding/masking is needed)."""
    tk_max = max(_LANE, tk_max - tk_max % _LANE)
    if D <= tk_max:
        return D
    if D % _LANE == 0:
        for t in range(tk_max, _LANE - 1, -_LANE):
            if D % t == 0:
                return t
    return tk_max


def _pick_b_tile(B, tb_max):
    """Batch tile: multiple of 8 (or the full batch), sized so the last tile
    is nearly full and there are >=2 tiles when B >= 16 (v7x has 2 TCs)."""
    min_tiles = 2 if B >= 16 else 1
    n_tiles = max(min_tiles, _cdiv(B, tb_max))
    tb = _round_up(_cdiv(B, n_tiles), _SUBLANE)
    if tb >= B:
        return B
    return tb


def _ensemble_kernel(x1_ref, x2_ref, wa_ref, wb_ref, bias_ref, out_ref,
                     acc_ref, *, tk, k_rem, grid_k, resident_weights):
    """out = x1 @ Wa' + x2 @ Wb' + b'   (classifier pre-folded into heads).

    grid = (batch tiles [parallel], K tiles [arbitrary reduction]).
    acc_ref: fp32 VMEM accumulator, persistent across the K axis.
    """
    k = pl.program_id(1)
    nk = pl.num_programs(1)

    @pl.when(k == 0)
    def _():
        acc_ref[...] = jnp.zeros_like(acc_ref)

    # In-kernel cast: x stays fp32 in HBM (single HBM read), bf16 on the MXU.
    x1 = x1_ref[...].astype(jnp.bfloat16)
    x2 = x2_ref[...].astype(jnp.bfloat16)

    if k_rem:
        # D is not a multiple of tk: zero the stale tail of the last K block
        # so it cannot contaminate valid rows of the accumulator.
        col = jax.lax.broadcasted_iota(jnp.int32, x1.shape, 1)
        limit = jnp.where(k == nk - 1, k_rem, tk)
        valid = col < limit
        zero = jnp.zeros_like(x1)
        x1 = jnp.where(valid, x1, zero)
        x2 = jnp.where(valid, x2, zero)

    if resident_weights and grid_k > 1:
        # Whole folded weights live in VMEM; slice the current K chunk.
        start = pl.multiple_of(k * tk, _LANE)  # grid_k > 1 => tk % 128 == 0
        wa = wa_ref[pl.ds(start, tk), :]
        wb = wb_ref[pl.ds(start, tk), :]
    else:
        wa = wa_ref[...]
        wb = wb_ref[...]

    acc_ref[...] += jnp.dot(x1, wa, preferred_element_type=jnp.float32)
    acc_ref[...] += jnp.dot(x2, wb, preferred_element_type=jnp.float32)

    @pl.when(k == nk - 1)
    def _():
        out_ref[...] = (acc_ref[...] + bias_ref[...]).astype(out_ref.dtype)


def fold_params(params):
    """Fold classifier Linear(14,7) into the two heads (fp32 math), cast the
    big [D,7] weights to bf16 for the MXU; bias stays fp32 (added on acc)."""
    wc = params["wc"]                  # [14, 7]
    bc = params["bc"]                  # [1, 7]
    wc_a = wc[:NUM_CLASSES]            # applied to modelA logits
    wc_b = wc[NUM_CLASSES:]            # applied to modelB logits
    wa_f = (params["wa"] @ wc_a).astype(jnp.bfloat16)   # [D, 7]
    wb_f = (params["wb"] @ wc_b).astype(jnp.bfloat16)   # [D, 7]
    bias = (params["ba"] @ wc_a + params["bb"] @ wc_b + bc).astype(jnp.float32)
    return wa_f, wb_f, bias


@functools.partial(jax.jit, static_argnames=("tb_max", "tk_max"))
def ensemble_forward(x1, x2, params, *, tb_max=512, tk_max=2048):
    """x1, x2: [B, C, H, W] float32 (NCHW). Returns [B, 7] float32."""
    B = x1.shape[0]
    # Pure metadata reshape -- no copy, no cast, no pad of the activations.
    x1f = x1.reshape(B, -1)
    x2f = x2.reshape(B, -1)
    D = x1f.shape[1]

    wa_f, wb_f, bias = fold_params(params)

    tk = _pick_k_tile(D, tk_max)
    tb = _pick_b_tile(B, tb_max)
    grid_k = _cdiv(D, tk)
    grid_b = _cdiv(B, tb)
    Dp = grid_k * tk
    k_rem = D % tk  # 0 whenever tk divides D (the common case)

    if Dp != D:
        # Only the tiny [D,7] folded weights are padded; activations never are.
        wa_f = jnp.pad(wa_f, ((0, Dp - D), (0, 0)))
        wb_f = jnp.pad(wb_f, ((0, Dp - D), (0, 0)))

    resident = (2 * Dp * _LANE * 2) <= _RESIDENT_WEIGHT_VMEM_BUDGET
    if resident:
        # Constant index_map: fetched once, VMEM-resident for the whole grid.
        w_spec = pl.BlockSpec((Dp, NUM_CLASSES), lambda i, k: (0, 0))
    else:
        # Streamed per K block (weights too big to pin in VMEM).
        w_spec = pl.BlockSpec((tk, NUM_CLASSES), lambda i, k: (k, 0))

    kernel = functools.partial(
        _ensemble_kernel, tk=tk, k_rem=k_rem, grid_k=grid_k,
        resident_weights=resident)

    itemsize = x1f.dtype.itemsize
    cost = pl.CostEstimate(
        flops=4 * B * D * NUM_CLASSES,           # two B x D x 7 matmuls
        transcendentals=0,
        bytes_accessed=(2 * B * D * itemsize     # x1, x2 read once
                        + 2 * Dp * NUM_CLASSES * 2   # bf16 folded weights
                        + B * NUM_CLASSES * 4))      # fp32 output

    out = pl.pallas_call(
        kernel,
        out_shape=jax.ShapeDtypeStruct((B, NUM_CLASSES), jnp.float32),
        grid_spec=pltpu.PrefetchScalarGridSpec(
            num_scalar_prefetch=0,
            grid=(grid_b, grid_k),
            in_specs=[
                # Activation tiles: double-buffered fp32 DMA straight from HBM.
                pl.BlockSpec((tb, tk), lambda i, k: (i, k)),
                pl.BlockSpec((tb, tk), lambda i, k: (i, k)),
                # Folded head weights.
                w_spec,
                w_spec,
                # Folded bias: constant index_map -> fetched once.
                pl.BlockSpec((1, NUM_CLASSES), lambda i, k: (0, 0)),
            ],
            out_specs=pl.BlockSpec((tb, NUM_CLASSES), lambda i, k: (i, 0)),
            scratch_shapes=[pltpu.VMEM((tb, NUM_CLASSES), jnp.float32)],
        ),
        compiler_params=pltpu.CompilerParams(
            dimension_semantics=("parallel", "arbitrary"),
            # Safe on v7x (64 MiB physical) while giving v5e/v6e headroom for
            # the double-buffered (tb, tk) fp32 activation tiles.
            vmem_limit_bytes=48 * 1024 * 1024,
        ),
        cost_estimate=cost,
    )(x1f, x2f, wa_f, wb_f, bias)

    return out


def init_params(key, in_features):
    """Deterministic parameter init (shapes follow the module's __init__)."""
    ks = jax.random.split(key, 6)
    scale_head = 1.0 / jnp.sqrt(jnp.float32(in_features))
    scale_cls = 1.0 / jnp.sqrt(jnp.float32(2 * NUM_CLASSES))
    return {
        # modelA / modelB final linear heads: [D, 7], bias kept 2D [1, 7]
        "wa": jax.random.uniform(ks[0], (in_features, NUM_CLASSES),
                                 jnp.float32, -scale_head, scale_head),
        "ba": jax.random.uniform(ks[1], (1, NUM_CLASSES),
                                 jnp.float32, -scale_head, scale_head),
        "wb": jax.random.uniform(ks[2], (in_features, NUM_CLASSES),
                                 jnp.float32, -scale_head, scale_head),
        "bb": jax.random.uniform(ks[3], (1, NUM_CLASSES),
                                 jnp.float32, -scale_head, scale_head),
        # classifier = nn.Linear(7 * 2, 7): [14, 7], bias [1, 7]
        "wc": jax.random.uniform(ks[4], (2 * NUM_CLASSES, NUM_CLASSES),
                                 jnp.float32, -scale_cls, scale_cls),
        "bc": jax.random.uniform(ks[5], (1, NUM_CLASSES),
                                 jnp.float32, -scale_cls, scale_cls),
    }


def reference_forward(x1, x2, params):
    """Pure-JAX fp32 reference mirroring the PyTorch forward (un-folded)."""
    B = x1.shape[0]
    x1f = x1.reshape(B, -1)
    x2f = x2.reshape(B, -1)
    a = x1f @ params["wa"] + params["ba"]
    b = x2f @ params["wb"] + params["bb"]
    out = jnp.concatenate([a, b], axis=1)
    return out @ params["wc"] + params["bc"]


if __name__ == "__main__":
    # Small shapes consistent with an image-classification ensemble.
    B, C, H, W = 2, 4, 16, 16
    D = C * H * W

    key = jax.random.PRNGKey(0)
    k1, k2, kp = jax.random.split(key, 3)
    x1 = jax.random.normal(k1, (B, C, H, W), jnp.float32)
    x2 = jax.random.normal(k2, (B, C, H, W), jnp.float32)
    params = init_params(kp, D)

    out = jax.block_until_ready(ensemble_forward(x1, x2, params))
    ref = reference_forward(x1, x2, params)

    assert out.shape == (B, NUM_CLASSES)
    # bf16 MXU inputs/weights + folded classifier: small quantization /
    # reassociation error vs. the fp32 reference.
    assert jnp.allclose(out, ref, atol=2e-2, rtol=2e-2), (
        f"max abs err = {jnp.max(jnp.abs(out - ref))}")
    print("KERNEL_OK")
</pallas_src>

<mosaic_0001>
module attributes {stable_mosaic.version = 11 : i64} {
  func.func @_ensemble_kernel(%arg0: i32, %arg1: i32, %arg2: memref<2x1024xf32, #tpu.memory_space<vmem>>, %arg3: memref<2x1024xf32, #tpu.memory_space<vmem>>, %arg4: memref<1024x7xbf16, #tpu.memory_space<vmem>>, %arg5: memref<1024x7xbf16, #tpu.memory_space<vmem>>, %arg6: memref<1x7xf32, #tpu.memory_space<vmem>>, %arg7: memref<2x7xf32, #tpu.memory_space<vmem>>, %arg8: memref<2x7xf32, #tpu.memory_space<vmem>>) attributes {dimension_semantics = [#tpu.dimension_semantics<parallel>, #tpu.dimension_semantics<arbitrary>], iteration_bounds = array<i64: 1, 1>, scalar_prefetch = 0 : i64, scratch_operands = 1 : i64, tpu.core_type = #tpu.core_type<tc>, window_params = [{transform_indices = @transform_0, window_bounds = array<i64: 2, 1024>}, {transform_indices = @transform_1, window_bounds = array<i64: 2, 1024>}, {pipeline_mode = #tpu.pipeline_mode<synchronous>, transform_indices = @transform_2, window_bounds = array<i64: 1024, 7>}, {pipeline_mode = #tpu.pipeline_mode<synchronous>, transform_indices = @transform_3, window_bounds = array<i64: 1024, 7>}, {pipeline_mode = #tpu.pipeline_mode<synchronous>, transform_indices = @transform_4, window_bounds = array<i64: 1, 7>}, {transform_indices = @transform_5, window_bounds = array<i64: 2, 7>}]} {
    %c0_i32 = arith.constant 0 : i32
    %0 = arith.cmpi eq, %arg1, %c0_i32 : i32
    %1 = arith.extui %0 : i1 to i32
    %c0_i32_0 = arith.constant 0 : i32
    %2 = arith.cmpi ne, %1, %c0_i32_0 : i32
    scf.if %2 {
      %cst_19 = arith.constant 0.000000e+00 : f32
      %20 = vector.broadcast %cst_19 : f32 to vector<2x7xf32>
      %c0_20 = arith.constant 0 : index
      %c0_21 = arith.constant 0 : index
      %21 = vector.load %arg8[%c0_20, %c0_21] : memref<2x7xf32, #tpu.memory_space<vmem>>, vector<2x7xf32>
      tpu.vector_store %arg8[%c0_20, %c0_21], %20 {strides = array<i32>} : memref<2x7xf32, #tpu.memory_space<vmem>>, vector<2x7xf32>,
    } else {
    }
    %c0 = arith.constant 0 : index
    %c0_1 = arith.constant 0 : index
    %3 = vector.load %arg2[%c0, %c0_1] : memref<2x1024xf32, #tpu.memory_space<vmem>>, vector<2x1024xf32>
    %4 = arith.truncf %3 : vector<2x1024xf32> to vector<2x1024xbf16>
    %c0_2 = arith.constant 0 : index
    %c0_3 = arith.constant 0 : index
    %5 = vector.load %arg3[%c0_2, %c0_3] : memref<2x1024xf32, #tpu.memory_space<vmem>>, vector<2x1024xf32>
    %6 = arith.truncf %5 : vector<2x1024xf32> to vector<2x1024xbf16>
    %c0_4 = arith.constant 0 : index
    %c0_5 = arith.constant 0 : index
    %7 = vector.load %arg4[%c0_4, %c0_5] : memref<1024x7xbf16, #tpu.memory_space<vmem>>, vector<1024x7xbf16>
    %c0_6 = arith.constant 0 : index
    %c0_7 = arith.constant 0 : index
    %8 = vector.load %arg5[%c0_6, %c0_7] : memref<1024x7xbf16, #tpu.memory_space<vmem>>, vector<1024x7xbf16>
    %c0_8 = arith.constant 0 : index
    %c0_9 = arith.constant 0 : index
    %9 = vector.load %arg8[%c0_8, %c0_9] : memref<2x7xf32, #tpu.memory_space<vmem>>, vector<2x7xf32>
    %cst = arith.constant dense<0.000000e+00> : vector<2x7xf32>
    %10 = tpu.matmul %4, %7, %cst {dimension_numbers = #tpu.dot_dimension_numbers<[1], [0], [0], [1], [0, 0, 1, 1], [], []>} : vector<2x1024xbf16>, vector<1024x7xbf16>, vector<2x7xf32> -> vector<2x7xf32>
    %11 = arith.addf %9, %10 : vector<2x7xf32>
    %c0_10 = arith.constant 0 : index
    %c0_11 = arith.constant 0 : index
    %12 = vector.load %arg8[%c0_10, %c0_11] : memref<2x7xf32, #tpu.memory_space<vmem>>, vector<2x7xf32>
    tpu.vector_store %arg8[%c0_10, %c0_11], %11 {strides = array<i32>} : memref<2x7xf32, #tpu.memory_space<vmem>>, vector<2x7xf32>,
    %c0_12 = arith.constant 0 : index
    %c0_13 = arith.constant 0 : index
    %13 = vector.load %arg8[%c0_12, %c0_13] : memref<2x7xf32, #tpu.memory_space<vmem>>, vector<2x7xf32>
    %cst_14 = arith.constant dense<0.000000e+00> : vector<2x7xf32>
    %14 = tpu.matmul %6, %8, %cst_14 {dimension_numbers = #tpu.dot_dimension_numbers<[1], [0], [0], [1], [0, 0, 1, 1], [], []>} : vector<2x1024xbf16>, vector<1024x7xbf16>, vector<2x7xf32> -> vector<2x7xf32>
    %15 = arith.addf %13, %14 : vector<2x7xf32>
    %c0_15 = arith.constant 0 : index
    %c0_16 = arith.constant 0 : index
    %16 = vector.load %arg8[%c0_15, %c0_16] : memref<2x7xf32, #tpu.memory_space<vmem>>, vector<2x7xf32>
    tpu.vector_store %arg8[%c0_15, %c0_16], %15 {strides = array<i32>} : memref<2x7xf32, #tpu.memory_space<vmem>>, vector<2x7xf32>,
    %c0_i32_17 = arith.constant 0 : i32
    %17 = arith.cmpi eq, %arg1, %c0_i32_17 : i32
    %18 = arith.extui %17 : i1 to i32
    %c0_i32_18 = arith.constant 0 : i32
    %19 = arith.cmpi ne, %18, %c0_i32_18 : i32
    scf.if %19 {
      %c0_19 = arith.constant 0 : index
      %c0_20 = arith.constant 0 : index
      %20 = vector.load %arg8[%c0_19, %c0_20] : memref<2x7xf32, #tpu.memory_space<vmem>>, vector<2x7xf32>
      %c0_21 = arith.constant 0 : index
      %c0_22 = arith.constant 0 : index
      %21 = vector.load %arg6[%c0_21, %c0_22] : memref<1x7xf32, #tpu.memory_space<vmem>>, vector<1x7xf32>
      %22 = vector.broadcast %21 : vector<1x7xf32> to vector<2x7xf32>
      %23 = arith.addf %20, %22 : vector<2x7xf32>
      %c0_23 = arith.constant 0 : index
      %c0_24 = arith.constant 0 : index
      %24 = vector.load %arg7[%c0_23, %c0_24] : memref<2x7xf32, #tpu.memory_space<vmem>>, vector<2x7xf32>
      tpu.vector_store %arg7[%c0_23, %c0_24], %23 {strides = array<i32>} : memref<2x7xf32, #tpu.memory_space<vmem>>, vector<2x7xf32>,
    } else {
    }
    return
  }
  func.func @transform_0(%arg0: i32, %arg1: i32) -> (i32, i32) {
    %c0_i32 = arith.constant 0 : i32
    return %arg0, %arg1 : i32, i32
  }
  func.func @transform_1(%arg0: i32, %arg1: i32) -> (i32, i32) {
    %c0_i32 = arith.constant 0 : i32
    return %arg0, %arg1 : i32, i32
  }
  func.func @transform_2(%arg0: i32, %arg1: i32) -> (i32, i32) {
    %c0_i32 = arith.constant 0 : i32
    %c0_i32_0 = arith.constant 0 : i32
    %c0_i32_1 = arith.constant 0 : i32
    return %c0_i32, %c0_i32_0 : i32, i32
  }
  func.func @transform_3(%arg0: i32, %arg1: i32) -> (i32, i32) {
    %c0_i32 = arith.constant 0 : i32
    %c0_i32_0 = arith.constant 0 : i32
    %c0_i32_1 = arith.constant 0 : i32
    return %c0_i32, %c0_i32_0 : i32, i32
  }
  func.func @transform_4(%arg0: i32, %arg1: i32) -> (i32, i32) {
    %c0_i32 = arith.constant 0 : i32
    %c0_i32_0 = arith.constant 0 : i32
    %c0_i32_1 = arith.constant 0 : i32
    return %c0_i32, %c0_i32_0 : i32, i32
  }
  func.func @transform_5(%arg0: i32, %arg1: i32) -> (i32, i32) {
    %c0_i32 = arith.constant 0 : i32
    %c0_i32_0 = arith.constant 0 : i32
    return %arg0, %c0_i32 : i32, i32
  }
}

</mosaic_0001>

<bundles_post_ra>
// kernel: ensemble_forward.1
= control target key start
LH: loop header
LB: loop body
LE: loop exit
PB: predicated region body
PF: predicated region fallthrough
CT: control target
= control target key end

     0   :  { %v36_v28 = vlaneseq  ;;  %v1978_v36 = vmov 1983009808   ;;  %s2436_s0 = inlined_call_operand.vmem [shape: f32[2,1024], index: 0, kind: input, shape index: {}]   ;;  %s2437_s1 = inlined_call_operand.vmem [shape: f32[2,1024], index: 1, kind: input, shape index: {}]   ;;  %s2438_s2 = inlined_call_operand.vmem [shape: bf16[1024,7], index: 2, kind: input, shape index: {}]   ;;  %s2439_s3 = inlined_call_operand.vmem [shape: bf16[1024,7], index: 3, kind: input, shape index: {}]   ;;  %s2440_s4 = inlined_call_operand.vmem [shape: f32[1,7], index: 4, kind: input, shape index: {}]   ;;  %s2441_s5 = inlined_call_operand.hbm [shape: f32[2,7], index: 5, kind: output, shape index: {}]  }
   0x1   :  { %v1822_v0 = vld [vmem:[%s2438_s2 + $0x40] sm:$0xff]   ;;  %v1826_v4 = vld [vmem:[%s2438_s2 + $0x48] sm:$0xff]   ;;  %v1830_v8 = vld [vmem:[%s2438_s2 + $0x50] sm:$0xff]   ;;  %v34_v37 = vunpack.c.l.s4 %v1978_v36 }
   0x2   :  { %v1823_v1 = vld [vmem:[%s2438_s2 + $0xc0] sm:$0xff]   ;;  %1643 = vmatprep.subr.bf16.mxu0 %v1822_v0  ;;  %v1827_v5 = vld [vmem:[%s2438_s2 + $0xc8] sm:$0xff]   ;;  %v1831_v9 = vld [vmem:[%s2438_s2 + $0xd0] sm:$0xff]   ;;  %v37_v33 = vshrl.u32 %v36_v28, 7 }
   0x3   :  { %v1824_v2 = vld [vmem:[%s2438_s2] sm:$0xff]   ;;  %1665 = vmatprep.subr.bf16.mxu1 %v1823_v1  ;;  %v1828_v6 = vld [vmem:[%s2438_s2 + $0x8] sm:$0xff]   ;;  %v1832_v10 = vld [vmem:[%s2438_s2 + $0x10] sm:$0xff]   ;;  %v35_v39 = vunpack.c.0.s8 %v34_v37 }
   0x4   :  { %v1825_v3 = vld [vmem:[%s2438_s2 + $0x80] sm:$0xff]   ;;  %1644 = vmatpush3.bf16.msra.mxu0 %v1824_v2  ;;  %v1829_v7 = vld [vmem:[%s2438_s2 + $0x88] sm:$0xff]   ;;  %v1833_v11 = vld [vmem:[%s2438_s2 + $0x90] sm:$0xff]  }
   0x5   :  { %1666 = vmatpush3.bf16.msra.mxu1 %v1825_v3  ;;  %1645 = vmatprep.subr.bf16.mxu0 %v1826_v4  ;;  %v1834_v12 = vld [vmem:[%s2438_s2 + $0x58] sm:$0xff]   ;;  %v1838_v16 = vld [vmem:[%s2438_s2 + $0x60] sm:$0xff]   ;;  %v1842_v20 = vld [vmem:[%s2438_s2 + $0x68] sm:$0xff]   ;;  %v2116_v41 = vsub.s32 %v35_v39, %v37_v33 }
   0x6   :  { %1667 = vmatprep.subr.bf16.mxu1 %v1827_v5  ;;  %v1835_v13 = vld [vmem:[%s2438_s2 + $0xd8] sm:$0xff]   ;;  %v1839_v17 = vld [vmem:[%s2438_s2 + $0xe0] sm:$0xff]   ;;  %v1843_v21 = vld [vmem:[%s2438_s2 + $0xe8] sm:$0xff]  }
   0x7   :  { %v1836_v14 = vld [vmem:[%s2438_s2 + $0x18] sm:$0xff]   ;;  %v1840_v18 = vld [vmem:[%s2438_s2 + $0x20] sm:$0xff]   ;;  %v1844_v22 = vld [vmem:[%s2438_s2 + $0x28] sm:$0xff]  }
   0x8   :  { %1646 = vmatpush3.bf16.msra.mxu0 %v1828_v6  ;;  %v1837_v15 = vld [vmem:[%s2438_s2 + $0x98] sm:$0xff]   ;;  %v1841_v19 = vld [vmem:[%s2438_s2 + $0xa0] sm:$0xff]   ;;  %v1845_v23 = vld [vmem:[%s2438_s2 + $0xa8] sm:$0xff]  }
   0x9   :  { %1668 = vmatpush3.bf16.msra.mxu1 %v1829_v7  ;;  %1647 = vmatprep.subr.bf16.mxu0 %v1830_v8  ;;  %v1846_v24 = vld [vmem:[%s2438_s2 + $0x70] sm:$0xff]   ;;  %v1850_v29 = vld [vmem:[%s2438_s2 + $0x78] sm:$0xff]   ;;  %v28_v34 = vld [vmem:[%s2436_s0] sm:$0xff] }
   0xa   :  { %1669 = vmatprep.subr.bf16.mxu1 %v1831_v9  ;;  %v1847_v25 = vld [vmem:[%s2438_s2 + $0xf0] sm:$0xff]   ;;  %v1851_v30 = vld [vmem:[%s2438_s2 + $0xf8] sm:$0xff]   ;;  %v1855_v35 = vld [vmem:[%s2438_s2 + $0x140] sm:$0xff]   ;;  %v32_v40 = vcombine.high %v28_v34, %v28_v34  ;;  %v39_v42 = vrot.slane %v28_v34, %v2116_v41 }
   0xb   :  { %v1848_v26 = vld [vmem:[%s2438_s2 + $0x30] sm:$0xff]   ;;  %v1852_v31 = vld [vmem:[%s2438_s2 + $0x38] sm:$0xff]   ;;  %v1856_v38 = vld [vmem:[%s2438_s2 + $0x1c0] sm:$0xff]  }
   0xc   :  { %1648 = vmatpush3.bf16.msra.mxu0 %v1832_v10  ;;  %v1849_v27 = vld [vmem:[%s2438_s2 + $0xb0] sm:$0xff]   ;;  %v1853_v32 = vld [vmem:[%s2438_s2 + $0xb8] sm:$0xff]   ;;  %v46_v43 = vrot.slane %v32_v40, %v2116_v41  ;;  %v47_v44 = vcombine.high %v39_v42, %v39_v42  ;;  %v1857_v46 = vld [vmem:[%s2438_s2 + $0x100] sm:$0xff]   ;;  %v74_v47 = vpack.c.bf16 %v39_v42, %v39_v42 }
   0xd   :  { %1670 = vmatpush3.bf16.msra.mxu1 %v1833_v11  ;;  %1649 = vmatprep.subr.bf16.mxu0 %v1834_v12  ;;  %v1858_v49 = vld [vmem:[%s2438_s2 + $0x180] sm:$0xff]   ;;  %v1859_v52 = vld [vmem:[%s2438_s2 + $0x148] sm:$0xff]   ;;  %v1863_v56 = vld [vmem:[%s2438_s2 + $0x150] sm:$0xff]  }
   0xe   :  { %1671 = vmatprep.subr.bf16.mxu1 %v1835_v13  ;;  %v48_v45 = vcombine.high %v46_v43, %v46_v43  ;;  %v76_v48 = vpack.c.bf16 %v46_v43, %v46_v43  ;;  %v75_v50 = vpack.c.bf16 %v47_v44, %v47_v44  ;;  %v1860_v53 = vld [vmem:[%s2438_s2 + $0x1c8] sm:$0xff]   ;;  %v1864_v57 = vld [vmem:[%s2438_s2 + $0x1d0] sm:$0xff]   ;;  %v1867_v60 = vld [vmem:[%s2438_s2 + $0x158] sm:$0xff]  }
   0xf   :  { %v1861_v54 = vld [vmem:[%s2438_s2 + $0x108] sm:$0xff]   ;;  %v1865_v58 = vld [vmem:[%s2438_s2 + $0x110] sm:$0xff]   ;;  %v1868_v61 = vld [vmem:[%s2438_s2 + $0x1d8] sm:$0xff]  }
  0x10   :  { %1650 = vmatpush3.bf16.msra.mxu0 %v1836_v14  ;;  %v77_v51 = vpack.c.bf16 %v48_v45, %v48_v45  ;;  %809 = vmatprep.mubr.bf16.mxu0 %v75_v50  ;;  %v1862_v55 = vld [vmem:[%s2438_s2 + $0x188] sm:$0xff]   ;;  %v1866_v59 = vld [vmem:[%s2438_s2 + $0x190] sm:$0xff]   ;;  %v1869_v62 = vld [vmem:[%s2438_s2 + $0x118] sm:$0xff]  }
  0x11   :  { %1672 = vmatpush3.bf16.msra.mxu1 %v1837_v15  ;;  %1651 = vmatprep.subr.bf16.mxu0 %v1838_v16  ;;  %v1870_v63 = vld [vmem:[%s2438_s2 + $0x198] sm:$0xff]   ;;  %v1871_v0 = vld [vmem:[%s2438_s2 + $0x160] sm:$0xff]   ;;  %v1875_v4 = vld [vmem:[%s2438_s2 + $0x168] sm:$0xff]  }
  0x12   :  { %1673 = vmatprep.subr.bf16.mxu1 %v1839_v17  ;;  %849 = vmatprep.mubr.bf16.mxu1 %v77_v51  ;;  %v1872_v1 = vld [vmem:[%s2438_s2 + $0x1e0] sm:$0xff]   ;;  %v1876_v5 = vld [vmem:[%s2438_s2 + $0x1e8] sm:$0xff]   ;;  %v1879_v8 = vld [vmem:[%s2438_s2 + $0x170] sm:$0xff]  }
  0x13   :  { %v1873_v2 = vld [vmem:[%s2438_s2 + $0x120] sm:$0xff]   ;;  %v1877_v6 = vld [vmem:[%s2438_s2 + $0x128] sm:$0xff]   ;;  %v1880_v9 = vld [vmem:[%s2438_s2 + $0x1f0] sm:$0xff]  }
  0x14   :  { %1652 = vmatpush3.bf16.msra.mxu0 %v1840_v18  ;;  %v1874_v3 = vld [vmem:[%s2438_s2 + $0x1a0] sm:$0xff]   ;;  %v1878_v7 = vld [vmem:[%s2438_s2 + $0x1a8] sm:$0xff]   ;;  %v1881_v11 = vld [vmem:[%s2438_s2 + $0x130] sm:$0xff]  }
  0x15   :  { %1674 = vmatpush3.bf16.msra.mxu1 %v1841_v19  ;;  %1653 = vmatprep.subr.bf16.mxu0 %v1842_v20  ;;  %v29_v10 = vld [vmem:[%s2436_s0 + $0x8] sm:$0xff]  ;;  %v1882_v14 = vld [vmem:[%s2438_s2 + $0x1b0] sm:$0xff]   ;;  %v1883_v15 = vld [vmem:[%s2438_s2 + $0x178] sm:$0xff]  }
  0x16   :  { %1675 = vmatprep.subr.bf16.mxu1 %v1843_v21  ;;  %v56_v12 = vrot.slane %v29_v10, %v2116_v41  ;;  %v49_v13 = vcombine.high %v29_v10, %v29_v10  ;;  %v1884_v18 = vld [vmem:[%s2438_s2 + $0x1f8] sm:$0xff]   ;;  %v1895_v33 = vld [vmem:[%s2439_s3 + $0x88] sm:$0xff]   ;;  %v1896_v34 = vld [vmem:[%s2439_s3 + $0x50] sm:$0xff]  }
  0x17   :  { %v1885_v19 = vld [vmem:[%s2438_s2 + $0x138] sm:$0xff]   ;;  %v1898_v36 = vld [vmem:[%s2439_s3 + $0x10] sm:$0xff]   ;;  %v1904_v43 = vld [vmem:[%s2439_s3 + $0x60] sm:$0xff]  }
  0x18   :  { %1654 = vmatpush3.bf16.msra.mxu0 %v1844_v22  ;;  %v64_v16 = vcombine.high %v56_v12, %v56_v12  ;;  %v63_v17 = vrot.slane %v49_v13, %v2116_v41  ;;  %v1886_v22 = vld [vmem:[%s2438_s2 + $0x1b8] sm:$0xff]   ;;  %v1899_v37 = vld [vmem:[%s2439_s3 + $0x90] sm:$0xff]   ;;  %v1905_v44 = vld [vmem:[%s2439_s3 + $0xe0] sm:$0xff]  }
  0x19   :  { %1676 = vmatpush3.bf16.msra.mxu1 %v1845_v23  ;;  %1655 = vmatprep.subr.bf16.mxu0 %v1846_v24  ;;  %v1888_v24 = vld [vmem:[%s2439_s3 + $0x40] sm:$0xff]   ;;  %v1901_v39 = vld [vmem:[%s2439_s3 + $0xd8] sm:$0xff]   ;;  %v1911_v50 = vld [vmem:[%s2439_s3 + $0xa8] sm:$0xff]  }
  0x1a   :  { %1677 = vmatprep.subr.bf16.mxu1 %v1847_v25  ;;  %v79_v20 = vpack.c.bf16 %v64_v16, %v64_v16  ;;  %v65_v21 = vcombine.high %v63_v17, %v63_v17  ;;  %v1889_v25 = vld [vmem:[%s2439_s3 + $0xc0] sm:$0xff]   ;;  %v80_v28 = vpack.c.bf16 %v63_v17, %v63_v17  ;;  %v1902_v40 = vld [vmem:[%s2439_s3 + $0x18] sm:$0xff]   ;;  %v1912_v51 = vld [vmem:[%s2439_s3 + $0x70] sm:$0xff]  }
  0x1b   :  { %v1903_v42 = vld [vmem:[%s2439_s3 + $0x98] sm:$0xff]   ;;  %v1906_v45 = vld [vmem:[%s2439_s3 + $0x20] sm:$0xff]   ;;  %v1926_v10 = vld [vmem:[%s2439_s3 + $0x1c8] sm:$0xff]  }
  0x1c   :  { %1656 = vmatpush3.bf16.msra.mxu0 %v1848_v26  ;;  %v81_v23 = vpack.c.bf16 %v65_v21, %v65_v21  ;;  %v1890_v26 = vld [vmem:[%s2439_s3] sm:$0xff]   ;;  %v1929_v13 = vld [vmem:[%s2439_s3 + $0x150] sm:$0xff]   ;;  %v1933_v17 = vld [vmem:[%s2439_s3 + $0x158] sm:$0xff]  }
  0x1d   :  { %1678 = vmatpush3.bf16.msra.mxu1 %v1849_v27  ;;  %1657 = vmatprep.subr.bf16.mxu0 %v1850_v29  ;;  %v78_v27 = vpack.c.bf16 %v56_v12, %v56_v12  ;;  %v1891_v29 = vld [vmem:[%s2439_s3 + $0x80] sm:$0xff]   ;;  %v1928_v12 = vld [vmem:[%s2439_s3 + $0x188] sm:$0xff]   ;;  %v1932_v16 = vld [vmem:[%s2439_s3 + $0x190] sm:$0xff]  }
  0x1e   :  { %1679 = vmatprep.subr.bf16.mxu1 %v1851_v30  ;;  %v1892_v30 = vld [vmem:[%s2439_s3 + $0x48] sm:$0xff]   ;;  %v1937_v21 = vld [vmem:[%s2439_s3 + $0x160] sm:$0xff]  }
  0x20   :  { %1658 = vmatpush3.bf16.msra.mxu0 %v1852_v31  ;;  %v1893_v31 = vld [vmem:[%s2439_s3 + $0xc8] sm:$0xff]  }
  0x21   :  { %1680 = vmatpush3.bf16.msra.mxu1 %v1853_v32  ;;  %1687 = vmatprep.subr.bf16.mxu0 %v1855_v35  ;;  %v1894_v32 = vld [vmem:[%s2439_s3 + $0x8] sm:$0xff]   ;;  %v1897_v35 = vld [vmem:[%s2439_s3 + $0xd0] sm:$0xff]  }
  0x22   :  { %1709 = vmatprep.subr.bf16.mxu1 %v1856_v38  ;;  %v1900_v38 = vld [vmem:[%s2439_s3 + $0x58] sm:$0xff]  }
  0x23   :  { %810 = vmatmul.mubr.bf16.vlgmr.msra.gmra.mrb[0].mxu0 %v74_v47  ;;  %v1908_v47 = vld [vmem:[%s2439_s3 + $0x68] sm:$0xff]  }
  0x24   :  { %850 = vmatmul.mubr.bf16.vlgmr.msra.gmra.mrb[0].mxu1 %v76_v48  ;;  %1688 = vmatpush3.bf16.msra.mxu0 %v1857_v46  ;;  %v1907_v46 = vld [vmem:[%s2439_s3 + $0xa0] sm:$0xff]   ;;  %v1909_v48 = vld [vmem:[%s2439_s3 + $0xe8] sm:$0xff]  }
  0x25   :  { %1710 = vmatpush3.bf16.msra.mxu1 %v1858_v49  ;;  %1689 = vmatprep.subr.bf16.mxu0 %v1859_v52  ;;  %v1910_v49 = vld [vmem:[%s2439_s3 + $0x28] sm:$0xff]   ;;  %v1913_v52 = vld [vmem:[%s2439_s3 + $0xf0] sm:$0xff]  }
  0x26   :  { %1711 = vmatprep.subr.bf16.mxu1 %v1860_v53  ;;  %889 = vmatprep.mubr.bf16.mxu0 %v79_v20  ;;  %v82_v53 = vld [vmem:[%s2437_s1] sm:$0xff]  ;;  %v1936_v20 = vld [vmem:[%s2439_s3 + $0x198] sm:$0xff]  }
  0x27   :  { %929 = vmatprep.mubr.bf16.mxu1 %v81_v23  ;;  %v1939_v23 = vld [vmem:[%s2439_s3 + $0x120] sm:$0xff]  }
  0x28   :  { %1690 = vmatpush3.bf16.msra.mxu0 %v1861_v54  ;;  %v1914_v54 = vld [vmem:[%s2439_s3 + $0x30] sm:$0xff]  }
  0x29   :  { %1712 = vmatpush3.bf16.msra.mxu1 %v1862_v55  ;;  %1691 = vmatprep.subr.bf16.mxu0 %v1863_v56  ;;  %v93_v55 = vrot.slane %v82_v53, %v2116_v41  ;;  %v86_v56 = vcombine.high %v82_v53, %v82_v53 }
  0x2a   :  { %1713 = vmatprep.subr.bf16.mxu1 %v1864_v57  ;;  %v1915_v57 = vld [vmem:[%s2439_s3 + $0xb0] sm:$0xff]  }
  0x2c   :  { %1692 = vmatpush3.bf16.msra.mxu0 %v1865_v58  ;;  %v1916_v58 = vld [vmem:[%s2439_s3 + $0x78] sm:$0xff]  }
  0x2d   :  { %1714 = vmatpush3.bf16.msra.mxu1 %v1866_v59  ;;  %1693 = vmatprep.subr.bf16.mxu0 %v1867_v60  ;;  %v101_v59 = vcombine.high %v93_v55, %v93_v55  ;;  %v100_v60 = vrot.slane %v86_v56, %v2116_v41 }
  0x2e   :  { %1715 = vmatprep.subr.bf16.mxu1 %v1868_v61  ;;  %v1917_v61 = vld [vmem:[%s2439_s3 + $0xf8] sm:$0xff]  }
  0x30   :  { %1694 = vmatpush3.bf16.msra.mxu0 %v1869_v62  ;;  %v1918_v62 = vld [vmem:[%s2439_s3 + $0x38] sm:$0xff]  }
  0x31   :  { %1716 = vmatpush3.bf16.msra.mxu1 %v1870_v63  ;;  %1695 = vmatprep.subr.bf16.mxu0 %v1871_v0  ;;  %v129_v63 = vpack.c.bf16 %v101_v59, %v101_v59  ;;  %v102_v0 = vcombine.high %v100_v60, %v100_v60 }
  0x32   :  { %1717 = vmatprep.subr.bf16.mxu1 %v1872_v1  ;;  %v1919_v1 = vld [vmem:[%s2439_s3 + $0xb8] sm:$0xff]  }
  0x34   :  { %1696 = vmatpush3.bf16.msra.mxu0 %v1873_v2  ;;  %v131_v2 = vpack.c.bf16 %v102_v0, %v102_v0 }
  0x35   :  { %1718 = vmatpush3.bf16.msra.mxu1 %v1874_v3  ;;  %1697 = vmatprep.subr.bf16.mxu0 %v1875_v4  ;;  %v1921_v3 = vld [vmem:[%s2439_s3 + $0x140] sm:$0xff]  }
  0x36   :  { %1719 = vmatprep.subr.bf16.mxu1 %v1876_v5  ;;  %v1922_v4 = vld [vmem:[%s2439_s3 + $0x1c0] sm:$0xff]  }
  0x37   :  { %v1923_v5 = vld [vmem:[%s2439_s3 + $0x100] sm:$0xff]  }
  0x38   :  { %1698 = vmatpush3.bf16.msra.mxu0 %v1877_v6  ;;  %v128_v6 = vpack.c.bf16 %v93_v55, %v93_v55 }
  0x39   :  { %1720 = vmatpush3.bf16.msra.mxu1 %v1878_v7  ;;  %1699 = vmatprep.subr.bf16.mxu0 %v1879_v8  ;;  %v130_v7 = vpack.c.bf16 %v100_v60, %v100_v60  ;;  %v1924_v8 = vld [vmem:[%s2439_s3 + $0x180] sm:$0xff]  }
  0x3a   :  { %1721 = vmatprep.subr.bf16.mxu1 %v1880_v9  ;;  %v1925_v9 = vld [vmem:[%s2439_s3 + $0x148] sm:$0xff]  }
  0x3c   :  { %1700 = vmatpush3.bf16.msra.mxu0 %v1881_v11  ;;  %v1927_v11 = vld [vmem:[%s2439_s3 + $0x108] sm:$0xff]  }
  0x3d   :  { %1722 = vmatpush3.bf16.msra.mxu1 %v1882_v14  ;;  %1701 = vmatprep.subr.bf16.mxu0 %v1883_v15  ;;  %v1930_v14 = vld [vmem:[%s2439_s3 + $0x1d0] sm:$0xff]  }
  0x3e   :  { %1723 = vmatprep.subr.bf16.mxu1 %v1884_v18  ;;  %v1931_v15 = vld [vmem:[%s2439_s3 + $0x110] sm:$0xff]   ;;  %v1934_v18 = vld [vmem:[%s2439_s3 + $0x1d8] sm:$0xff]  }
  0x40   :  { %1702 = vmatpush3.bf16.msra.mxu0 %v1885_v19  ;;  %v1935_v19 = vld [vmem:[%s2439_s3 + $0x118] sm:$0xff]  }
  0x41   :  { %1724 = vmatpush3.bf16.msra.mxu1 %v1886_v22  ;;  %1731 = vmatprep.subr.bf16.mxu0 %v1888_v24  ;;  %v1938_v22 = vld [vmem:[%s2439_s3 + $0x1e0] sm:$0xff]  }
  0x42   :  { %1753 = vmatprep.subr.bf16.mxu1 %v1889_v25  ;;  %v1940_v24 = vld [vmem:[%s2439_s3 + $0x1a0] sm:$0xff]   ;;  %v1941_v25 = vld [vmem:[%s2439_s3 + $0x168] sm:$0xff]  }
  0x43   :  { %890 = vmatmul.mubr.bf16.vlgmr.msra.gmra.mrb[4].mxu0 %v78_v27  ;;  %v1943_v27 = vld [vmem:[%s2439_s3 + $0x128] sm:$0xff]  }
  0x44   :  { %930 = vmatmul.mubr.bf16.vlgmr.msra.gmra.mrb[4].mxu1 %v80_v28  ;;  %1732 = vmatpush3.bf16.msra.mxu0 %v1890_v26  ;;  %v1942_v26 = vld [vmem:[%s2439_s3 + $0x1e8] sm:$0xff]  }
  0x45   :  { %1754 = vmatpush3.bf16.msra.mxu1 %v1891_v29  ;;  %1733 = vmatprep.subr.bf16.mxu0 %v1892_v30  ;;  %v1944_v28 = vld [vmem:[%s2439_s3 + $0x1a8] sm:$0xff]   ;;  %v1945_v29 = vld [vmem:[%s2439_s3 + $0x170] sm:$0xff]  }
  0x46   :  { %1755 = vmatprep.subr.bf16.mxu1 %v1893_v31  ;;  %1357 = vmatprep.mubr.bf16.mxu0 %v129_v63  ;;  %v1946_v30 = vld [vmem:[%s2439_s3 + $0x1f0] sm:$0xff]   ;;  %v83_v31 = vld [vmem:[%s2437_s1 + $0x8] sm:$0xff] }
  0x47   :  { %1397 = vmatprep.mubr.bf16.mxu1 %v131_v2 }
  0x48   :  { %1734 = vmatpush3.bf16.msra.mxu0 %v1894_v32 }
  0x49   :  { %1756 = vmatpush3.bf16.msra.mxu1 %v1895_v33  ;;  %1735 = vmatprep.subr.bf16.mxu0 %v1896_v34 }
  0x4a   :  { %1757 = vmatprep.subr.bf16.mxu1 %v1897_v35 }
  0x4c   :  { %1736 = vmatpush3.bf16.msra.mxu0 %v1898_v36 }
  0x4d   :  { %1758 = vmatpush3.bf16.msra.mxu1 %v1899_v37  ;;  %1737 = vmatprep.subr.bf16.mxu0 %v1900_v38 }
  0x4e   :  { %1759 = vmatprep.subr.bf16.mxu1 %v1901_v39 }
  0x50   :  { %1738 = vmatpush3.bf16.msra.mxu0 %v1902_v40 }
  0x51   :  { %1760 = vmatpush3.bf16.msra.mxu1 %v1903_v42  ;;  %1739 = vmatprep.subr.bf16.mxu0 %v1904_v43 }
  0x52   :  { %1761 = vmatprep.subr.bf16.mxu1 %v1905_v44 }
  0x54   :  { %1740 = vmatpush3.bf16.msra.mxu0 %v1906_v45 }
  0x55   :  { %1762 = vmatpush3.bf16.msra.mxu1 %v1907_v46  ;;  %1741 = vmatprep.subr.bf16.mxu0 %v1908_v47 }
  0x56   :  { %1763 = vmatprep.subr.bf16.mxu1 %v1909_v48 }
  0x58   :  { %1742 = vmatpush3.bf16.msra.mxu0 %v1910_v49 }
  0x59   :  { %1764 = vmatpush3.bf16.msra.mxu1 %v1911_v50  ;;  %1743 = vmatprep.subr.bf16.mxu0 %v1912_v51 }
  0x5a   :  { %1765 = vmatprep.subr.bf16.mxu1 %v1913_v52 }
  0x5c   :  { %1744 = vmatpush3.bf16.msra.mxu0 %v1914_v54 }
  0x5d   :  { %1766 = vmatpush3.bf16.msra.mxu1 %v1915_v57  ;;  %1745 = vmatprep.subr.bf16.mxu0 %v1916_v58 }
  0x5e   :  { %1767 = vmatprep.subr.bf16.mxu1 %v1917_v61 }
  0x60   :  { %1746 = vmatpush3.bf16.msra.mxu0 %v1918_v62 }
  0x61   :  { %1768 = vmatpush3.bf16.msra.mxu1 %v1919_v1  ;;  %1775 = vmatprep.subr.bf16.mxu0 %v1921_v3 }
  0x62   :  { %1797 = vmatprep.subr.bf16.mxu1 %v1922_v4 }
  0x63   :  { %1358 = vmatmul.mubr.bf16.vlgmr.msra.gmra.mrb[8].mxu0 %v128_v6 }
  0x64   :  { %1398 = vmatmul.mubr.bf16.vlgmr.msra.gmra.mrb[8].mxu1 %v130_v7  ;;  %1776 = vmatpush3.bf16.msra.mxu0 %v1923_v5 }
  0x65   :  { %1798 = vmatpush3.bf16.msra.mxu1 %v1924_v8  ;;  %1777 = vmatprep.subr.bf16.mxu0 %v1925_v9 }
  0x66   :  { %1799 = vmatprep.subr.bf16.mxu1 %v1926_v10 }
  0x68   :  { %1778 = vmatpush3.bf16.msra.mxu0 %v1927_v11 }
  0x69   :  { %1800 = vmatpush3.bf16.msra.mxu1 %v1928_v12  ;;  %1779 = vmatprep.subr.bf16.mxu0 %v1929_v13 }
  0x6a   :  { %1801 = vmatprep.subr.bf16.mxu1 %v1930_v14 }
  0x6c   :  { %1780 = vmatpush3.bf16.msra.mxu0 %v1931_v15 }
  0x6d   :  { %1802 = vmatpush3.bf16.msra.mxu1 %v1932_v16  ;;  %1781 = vmatprep.subr.bf16.mxu0 %v1933_v17 }
  0x6e   :  { %1803 = vmatprep.subr.bf16.mxu1 %v1934_v18 }
  0x70   :  { %1782 = vmatpush3.bf16.msra.mxu0 %v1935_v19 }
  0x71   :  { %1804 = vmatpush3.bf16.msra.mxu1 %v1936_v20  ;;  %1783 = vmatprep.subr.bf16.mxu0 %v1937_v21 }
  0x72   :  { %1805 = vmatprep.subr.bf16.mxu1 %v1938_v22 }
  0x74   :  { %1784 = vmatpush3.bf16.msra.mxu0 %v1939_v23 }
  0x75   :  { %1806 = vmatpush3.bf16.msra.mxu1 %v1940_v24  ;;  %1785 = vmatprep.subr.bf16.mxu0 %v1941_v25 }
  0x76   :  { %1807 = vmatprep.subr.bf16.mxu1 %v1942_v26 }
  0x77   :  { %10 = vsyncpa [#allocation4], 0  ;;  %v110_v32 = vrot.slane %v83_v31, %v2116_v41  ;;  %v103_v33 = vcombine.high %v83_v31, %v83_v31  ;;  %v1947_v34 = vld [vmem:[%s2439_s3 + $0x130] sm:$0xff]   ;;  %v1949_v36 = vld [vmem:[%s2439_s3 + $0x178] sm:$0xff]   ;;  %vm26_vm0 = vcmask 50176   ;;  %s1980_s21 = smov [#allocation3]  }
  0x78   :  { %1786 = vmatpush3.bf16.msra.mxu0 %v1943_v27  ;;  %v1948_v35 = vld [vmem:[%s2439_s3 + $0x1b0] sm:$0xff]   ;;  %v1950_v37 = vld [vmem:[%s2439_s3 + $0x1f8] sm:$0xff]   ;;  %s1506_s22 = sshll.u32 %s1980_s21, 4  ;;  %s1507_s22 = int_to_ptr.vmem [resolvable:$true] %s1506_s22 }
  0x79   :  { %1808 = vmatpush3.bf16.msra.mxu1 %v1944_v28  ;;  %1787 = vmatprep.subr.bf16.mxu0 %v1945_v29  ;;  %v118_v38 = vcombine.high %v110_v32, %v110_v32  ;;  %v117_v39 = vrot.slane %v103_v33, %v2116_v41  ;;  %v1951_v43 = vld [vmem:[%s2439_s3 + $0x138] sm:$0xff]   ;;  %v132_v46 = vpack.c.bf16 %v110_v32, %v110_v32  ;;  %v1979_v41 = vmov 0.0   ;;  %s1954_s23 = scalar_lea.vmem %s1507_s22, 32  ;;  %p1959_p1 = scmp.lt.s32.totalorder %s1507_s22, %s1507_s22 }
  0x7a   :  { %1809 = vmatprep.subr.bf16.mxu1 %v1946_v30  ;;  %v1952_v44 = vld [vmem:[%s2439_s3 + $0x1b8] sm:$0xff]   ;;  %27 = vst.msk [vmem:[#allocation2] sm:$0x3] %vm26_vm0, %v1979_v41  ;;  %p1955_p0 = scmp.ne.s32.totalorder %s1507_s22, %s1954_s23  ;;  %p1960_p2 = scmp.lt.s32.totalorder %s1954_s23, %s1954_s23 }
  0x7b   :  { %v133_v40 = vpack.c.bf16 %v118_v38, %v118_v38  ;;  %v119_v42 = vcombine.high %v117_v39, %v117_v39  ;;  %v134_v47 = vpack.c.bf16 %v117_v39, %v117_v39 }
  0x7c   :  { %1788 = vmatpush3.bf16.msra.mxu0 %v1947_v34  ;;  %v1642_v34 = vld [vmem:[%s2440_s4] ss:$0 sm:$0xff]  ;;  %p1961_p3 = por %p1960_p2, %p1959_p1 }
  0x7d   :  { %1810 = vmatpush3.bf16.msra.mxu1 %v1948_v35  ;;  %1789 = vmatprep.subr.bf16.mxu0 %v1949_v36  ;;  %v135_v45 = vpack.c.bf16 %v119_v42, %v119_v42 }
  0x7e   :  { %1811 = vmatprep.subr.bf16.mxu1 %v1950_v37  ;;  %1437 = vmatprep.mubr.bf16.mxu0 %v133_v40  ;;  %p1962_p4 = pnand %p1961_p3, %p1955_p0 }
  0x7f   :  { %1477 = vmatprep.mubr.bf16.mxu1 %v135_v45 }
  0x80   :  { %1790 = vmatpush3.bf16.msra.mxu0 %v1951_v43 }
  0x81   :  { %1812 = vmatpush3.bf16.msra.mxu1 %v1952_v44  ;;  %v392_v6 = vld [vmem:[#allocation2] sm:$0x3] }
  0x83   :  { %1438 = vmatmul.mubr.bf16.vlgmr.msra.gmra.mrb[12].mxu0 %v132_v46 }
  0x84   :  { %1478 = vmatmul.mubr.bf16.vlgmr.msra.gmra.mrb[12].mxu1 %v134_v47 }
  0xf6   :  { %v1659_v48 = vpop.f32.mrb[0].mxu0 }
  0xf7   :  { %v1681_v49 = vpop.f32.mrb[0].mxu1  ;;  %v1660_v50 = vpop.f32.mrb[1].mxu0 }
  0xf8   :  { %v1682_v51 = vpop.f32.mrb[1].mxu1  ;;  %v1661_v52 = vadd.f32 %v1660_v50, %v1659_v48  ;;  %v1662_v54 = vpop.f32.mrb[2].mxu0 }
  0xf9   :  { %v1683_v53 = vadd.f32 %v1682_v51, %v1681_v49  ;;  %v1684_v55 = vpop.f32.mrb[2].mxu1  ;;  %v1663_v56 = vpop.f32.mrb[3].mxu0 }
  0xfa   :  { %v1685_v57 = vpop.f32.mrb[3].mxu1 }
  0xfb   :  { %v852_v58 = vadd.f32 %v1683_v53, %v1661_v52 }
 0x116   :  { %v1703_v59 = vpop.f32.mrb[4].mxu0 }
 0x117   :  { %v1725_v60 = vpop.f32.mrb[4].mxu1  ;;  %v1704_v61 = vpop.f32.mrb[5].mxu0 }
 0x118   :  { %v1726_v62 = vpop.f32.mrb[5].mxu1  ;;  %v1705_v63 = vadd.f32 %v1704_v61, %v1703_v59  ;;  %v1706_v1 = vpop.f32.mrb[6].mxu0 }
 0x119   :  { %v1727_v0 = vadd.f32 %v1726_v62, %v1725_v60  ;;  %v1728_v2 = vpop.f32.mrb[6].mxu1  ;;  %v1707_v3 = vpop.f32.mrb[7].mxu0 }
 0x11a   :  { %v1729_v4 = vpop.f32.mrb[7].mxu1  ;;  %v892_v5 = vadd.f32 %v1705_v63, %v852_v58 }
 0x11c   :  { %v932_v7 = vadd.f32 %v1727_v0, %v892_v5 }
 0x11e   :  { %v937_v8 = vadd.f32 %v932_v7, %v392_v6 }
 0x120   :  { %939 = vst.msk [vmem:[#allocation2] sm:$0x3] %vm26_vm0, %v937_v8 }
 0x127   :  { %v940_v32 = vld [vmem:[#allocation2] sm:$0x3] }
 0x136   :  { %v1747_v9 = vpop.f32.mrb[8].mxu0 }
 0x137   :  { %v1769_v10 = vpop.f32.mrb[8].mxu1  ;;  %v1748_v11 = vpop.f32.mrb[9].mxu0 }
 0x138   :  { %v1770_v12 = vpop.f32.mrb[9].mxu1  ;;  %v1749_v13 = vadd.f32 %v1748_v11, %v1747_v9  ;;  %v1750_v15 = vpop.f32.mrb[10].mxu0 }
 0x139   :  { %v1771_v14 = vadd.f32 %v1770_v12, %v1769_v10  ;;  %v1772_v16 = vpop.f32.mrb[10].mxu1  ;;  %v1751_v17 = vpop.f32.mrb[11].mxu0 }
 0x13a   :  { %v1773_v18 = vpop.f32.mrb[11].mxu1 }
 0x13b   :  { %v1400_v19 = vadd.f32 %v1771_v14, %v1749_v13 }
 0x156   :  { %v1791_v20 = vpop.f32.mrb[12].mxu0 }
 0x157   :  { %v1813_v21 = vpop.f32.mrb[12].mxu1  ;;  %v1792_v22 = vpop.f32.mrb[13].mxu0 }
 0x158   :  { %v1814_v23 = vpop.f32.mrb[13].mxu1  ;;  %v1793_v24 = vadd.f32 %v1792_v22, %v1791_v20  ;;  %v1794_v26 = vpop.f32.mrb[14].mxu0 }
 0x159   :  { %v1815_v25 = vadd.f32 %v1814_v23, %v1813_v21  ;;  %v1816_v27 = vpop.f32.mrb[14].mxu1  ;;  %v1795_v28 = vpop.f32.mrb[15].mxu0 }
 0x15a   :  { %v1817_v29 = vpop.f32.mrb[15].mxu1  ;;  %v1440_v30 = vadd.f32 %v1793_v24, %v1400_v19 }
 0x15c   :  { %v1480_v31 = vadd.f32 %v1815_v25, %v1440_v30 }
 0x15e   :  { %v1485_v33 = vadd.f32 %v1480_v31, %v940_v32 }
 0x160   :  { %1486 = vst.msk [vmem:[#allocation2] sm:$0x3] %vm26_vm0, %v1485_v33 }
 0x167   :  { %v1490_v35 = vld [vmem:[#allocation2] sm:$0x3] }
 0x168   :  { %v1498_v36 = vadd.f32 %v1642_v34, %v1490_v35 }
 0x16a   :  { %1499 = vst.msk [vmem:[#allocation3] sm:$0x3] %vm26_vm0, %v1498_v36 }
 0x16b   :  { %1965 = shalt.err (!%p1962_p4)
}
 0x16c   :  { %s1966_s26 = scalar_lea.hbm %s2441_s5, 32 }
 0x16d   :  { %p1967_p5 = scmp.ne.s32.totalorder %s2441_s5, %s1966_s26  ;;  %p1970_p6 = scmp.lt.u32.totalorder %s1966_s26, %s2441_s5 }
 0x16f   :  { %p1972_p7 = pnand %p1970_p6, %p1967_p5 }
 0x171   :  { %1975 = shalt.err (!%p1972_p7)
}
 0x172   :  { %1509 = dma.vmem_to_hbm [thread:$0]  %s1507_s22, 32, %s2441_s5, [#allocation4]  }
 0x173   :  { %1976 = dma.done.wait [#allocation4], 32  }
 0x174   :  { %1977 = vsyncadd [#allocation4], 4294967264 }
 0x175   :  { %1513 = vsyncpa [#allocation4], 1 }

</bundles_post_ra>
